<compile_context>
chip_gen: v7x
topology: tpu7x:2x2x1
jax: 0.10.0
libtpu: 0.0.40
codegen_flags: <defaults>
</compile_context>

<pallas_src>
import jax
import jax.numpy as jnp
from jax.experimental import pallas as pl
from jax.experimental.pallas import tpu as pltpu

# ---------------- model dimensions ----------------
B = 2            # batch
CIN = 3          # input channels (module probes base_model with (1,3,32,32))
H = W = 32       # spatial
COUT = 16        # base_model conv output channels -> actual_dim
TARGET = 32      # target_dim of the feature adapter
KH = KW = 3      # conv kernel
KK = CIN * KH * KW   # 27 im2col rows (channel-major tap ordering)
HW = H * W           # 1024 output positions -> lane axis, (8,128)-aligned
BN_EPS = 1e-5


# ---------------- fused Pallas kernel ----------------
def fused_kernel(patches_ref, wconv_ref, bconv_ref, wadapt_ref, badapt_ref,
                 adapted_ref, feat_ref):
    """conv3x3 (one K=27 dot) + ReLU + global-avg-pool + (Linear·BN) + ReLU.

    patches_ref: (B, KK, HW)     im2col slab, channel-major taps, lane-dense
    wconv_ref:   (COUT, KK)      conv weight, matching tap ordering
    bconv_ref:   (COUT, 1)       conv bias (broadcasts over lanes)
    wadapt_ref:  (COUT, TARGET)  BN(eval)-folded adapter weight
    badapt_ref:  (1, TARGET)     BN(eval)-folded adapter bias
    adapted_ref: (B, TARGET)     Linear+BN+ReLU output
    feat_ref:    (B, COUT)       pooled base-model features
    """
    wconv = wconv_ref[...]
    bconv = bconv_ref[...]
    cols = []
    for b in range(B):                                   # B = 2, unrolled
        # Single K=27 contraction per image (review #1): (16,27)@(27,1024).
        y = jnp.dot(wconv, patches_ref[b],
                    preferred_element_type=jnp.float32)  # (COUT, HW)
        y = jnp.maximum(y + bconv, 0.0)                  # conv bias + ReLU
        # adaptive_avg_pool2d((1,1)): plain lane-axis mean (all HW lanes real),
        # no transpose of the big (COUT, HW) tile (review #2), no mask (review #7).
        cols.append(jnp.mean(y, axis=1, keepdims=True))  # (COUT, 1)

    feats = jnp.concatenate(cols, axis=1).T              # tiny (COUT,B)->(B,COUT)
    feat_ref[...] = feats

    # AdaptiveFeatureProjection: Linear (BN folded in) + ReLU; Dropout = id (eval)
    z = jnp.dot(feats, wadapt_ref[...],
                preferred_element_type=jnp.float32) + badapt_ref[...]
    adapted_ref[...] = jnp.maximum(z, 0.0)


# ---------------- wrapper ----------------
def enhanced_feature_extractor(x_nchw, kp):
    """x_nchw: (B, CIN, H, W) like PyTorch. Returns (adapted, features)."""
    x = x_nchw.astype(jnp.float32)
    # Wrapper-side im2col in ONE XLA op (identity-kernel conv), review #3/#6.
    # Output feature ordering is channel-major (c, kh, kw) -> matches the
    # conv_w.reshape(COUT, KK) layout produced in prepare_kernel_params.
    patches = jax.lax.conv_general_dilated_patches(
        x, (KH, KW), (1, 1), "SAME",
        dimension_numbers=("NCHW", "OIHW", "NCHW"))       # (B, KK, H, W)
    patches = patches.reshape(B, KK, HW)                  # collapse trailing dims

    vmem = pl.BlockSpec(memory_space=pltpu.MemorySpace.VMEM)  # whole-array blocks
    adapted, feats = pl.pallas_call(
        fused_kernel,
        out_shape=(jax.ShapeDtypeStruct((B, TARGET), jnp.float32),
                   jax.ShapeDtypeStruct((B, COUT), jnp.float32)),
        in_specs=[vmem] * 5,
        out_specs=(vmem, vmem),
    )(patches, kp["conv_w"], kp["conv_b"], kp["adapt_w"], kp["adapt_b"])
    return adapted, feats


# ---------------- parameters ----------------
def init_params(key):
    """Raw, PyTorch-layout parameters (deterministic synthetic init)."""
    k_cw, k_cb, k_pw, k_pb = jax.random.split(key, 4)
    return {
        "conv_w": jax.random.normal(k_cw, (COUT, CIN, KH, KW), jnp.float32) * 0.1,
        "conv_b": jax.random.normal(k_cb, (COUT,), jnp.float32) * 0.01,
        "proj_w": jax.random.normal(k_pw, (COUT, TARGET), jnp.float32) * 0.1,
        "proj_b": jax.random.normal(k_pb, (TARGET,), jnp.float32) * 0.01,
        "bn_gamma": jnp.ones((TARGET,), jnp.float32),
        "bn_beta": jnp.zeros((TARGET,), jnp.float32),
        "bn_mean": jnp.zeros((TARGET,), jnp.float32),
        "bn_var": jnp.ones((TARGET,), jnp.float32),
    }


def prepare_kernel_params(p):
    """One-time re-layout + BatchNorm1d(eval) constant folding."""
    conv_w = p["conv_w"].reshape(COUT, KK)        # (c, kh, kw)-major taps -> K=27
    conv_b = p["conv_b"].reshape(COUT, 1)
    scale = p["bn_gamma"] * jax.lax.rsqrt(p["bn_var"] + BN_EPS)          # (TARGET,)
    adapt_w = p["proj_w"] * scale[None, :]                                # (COUT, TARGET)
    adapt_b = ((p["proj_b"] - p["bn_mean"]) * scale + p["bn_beta"]).reshape(1, TARGET)
    return {"conv_w": conv_w, "conv_b": conv_b,
            "adapt_w": adapt_w, "adapt_b": adapt_b}


# ---------------- plain-JAX reference (raw params, independent math) ----------------
def reference(x_nchw, p):
    x = x_nchw.astype(jnp.float32)
    y = jax.lax.conv_general_dilated(
        x, p["conv_w"], window_strides=(1, 1), padding="SAME",
        dimension_numbers=("NCHW", "OIHW", "NCHW"),
        precision=jax.lax.Precision.HIGHEST)
    y = jnp.maximum(y + p["conv_b"][None, :, None, None], 0.0)
    feats = jnp.mean(y, axis=(2, 3))
    z = jnp.dot(feats, p["proj_w"], precision=jax.lax.Precision.HIGHEST) + p["proj_b"]
    z = (z - p["bn_mean"]) * jax.lax.rsqrt(p["bn_var"] + BN_EPS)
    z = z * p["bn_gamma"] + p["bn_beta"]
    return jnp.maximum(z, 0.0), feats


if __name__ == "__main__":
    key = jax.random.PRNGKey(0)
    k_x, k_p = jax.random.split(key)
    x = jax.random.normal(k_x, (B, CIN, H, W), jnp.float32)   # NCHW like PyTorch
    raw_params = init_params(k_p)
    kparams = prepare_kernel_params(raw_params)               # one-time folding

    fwd = jax.jit(enhanced_feature_extractor)
    adapted, features = jax.block_until_ready(fwd(x, kparams))

    ref_adapted, ref_features = reference(x, raw_params)
    assert adapted.shape == (B, TARGET) and features.shape == (B, COUT)
    assert jnp.allclose(features, ref_features, atol=1e-4, rtol=1e-4), \
        float(jnp.max(jnp.abs(features - ref_features)))
    assert jnp.allclose(adapted, ref_adapted, atol=1e-4, rtol=1e-4), \
        float(jnp.max(jnp.abs(adapted - ref_adapted)))

    print("KERNEL_OK")
</pallas_src>

<mosaic_0001>
module attributes {stable_mosaic.version = 11 : i64} {
  func.func @fused_kernel(%arg0: memref<2x27x1024xf32, #tpu.memory_space<vmem>>, %arg1: memref<16x27xf32, #tpu.memory_space<vmem>>, %arg2: memref<16x1xf32, #tpu.memory_space<vmem>>, %arg3: memref<16x32xf32, #tpu.memory_space<vmem>>, %arg4: memref<1x32xf32, #tpu.memory_space<vmem>>, %arg5: memref<2x32xf32, #tpu.memory_space<vmem>>, %arg6: memref<2x16xf32, #tpu.memory_space<vmem>>) attributes {dimension_semantics = [], scalar_prefetch = 0 : i64, scratch_operands = 0 : i64, tpu.core_type = #tpu.core_type<tc>} {
    %c0 = arith.constant 0 : index
    %c0_0 = arith.constant 0 : index
    %0 = vector.load %arg1[%c0, %c0_0] : memref<16x27xf32, #tpu.memory_space<vmem>>, vector<16x27xf32>
    %c0_1 = arith.constant 0 : index
    %c0_2 = arith.constant 0 : index
    %1 = vector.load %arg2[%c0_1, %c0_2] : memref<16x1xf32, #tpu.memory_space<vmem>>, vector<16x1xf32>
    %c0_3 = arith.constant 0 : index
    %c0_4 = arith.constant 0 : index
    %c0_5 = arith.constant 0 : index
    %2 = vector.load %arg0[%c0_3, %c0_4, %c0_5] : memref<2x27x1024xf32, #tpu.memory_space<vmem>>, vector<1x27x1024xf32>
    %3 = vector.shape_cast %2 : vector<1x27x1024xf32> to vector<27x1024xf32>
    %cst = arith.constant dense<0.000000e+00> : vector<16x1024xf32>
    %4 = tpu.matmul %0, %3, %cst {dimension_numbers = #tpu.dot_dimension_numbers<[1], [0], [0], [1], [0, 0, 1, 1], [], []>} : vector<16x27xf32>, vector<27x1024xf32>, vector<16x1024xf32> -> vector<16x1024xf32>
    %5 = vector.broadcast %1 : vector<16x1xf32> to vector<16x1024xf32>
    %6 = arith.addf %4, %5 : vector<16x1024xf32>
    %cst_6 = arith.constant 0.000000e+00 : f32
    %7 = vector.broadcast %cst_6 : f32 to vector<16x1024xf32>
    %8 = arith.maximumf %6, %7 : vector<16x1024xf32>
    %cst_7 = arith.constant dense<0.000000e+00> : vector<16xf32>
    %9 = vector.multi_reduction <add>, %8, %cst_7 [1] : vector<16x1024xf32> to vector<16xf32>
    %10 = vector.shape_cast %9 : vector<16xf32> to vector<16x1xf32>
    %cst_8 = arith.constant 1.024000e+03 : f32
    %11 = vector.broadcast %cst_8 : f32 to vector<16x1xf32>
    %12 = arith.divf %10, %11 : vector<16x1xf32>
    %c1 = arith.constant 1 : index
    %c0_9 = arith.constant 0 : index
    %c0_10 = arith.constant 0 : index
    %13 = vector.load %arg0[%c1, %c0_9, %c0_10] : memref<2x27x1024xf32, #tpu.memory_space<vmem>>, vector<1x27x1024xf32>
    %14 = vector.shape_cast %13 : vector<1x27x1024xf32> to vector<27x1024xf32>
    %cst_11 = arith.constant dense<0.000000e+00> : vector<16x1024xf32>
    %15 = tpu.matmul %0, %14, %cst_11 {dimension_numbers = #tpu.dot_dimension_numbers<[1], [0], [0], [1], [0, 0, 1, 1], [], []>} : vector<16x27xf32>, vector<27x1024xf32>, vector<16x1024xf32> -> vector<16x1024xf32>
    %16 = vector.broadcast %1 : vector<16x1xf32> to vector<16x1024xf32>
    %17 = arith.addf %15, %16 : vector<16x1024xf32>
    %cst_12 = arith.constant 0.000000e+00 : f32
    %18 = vector.broadcast %cst_12 : f32 to vector<16x1024xf32>
    %19 = arith.maximumf %17, %18 : vector<16x1024xf32>
    %cst_13 = arith.constant dense<0.000000e+00> : vector<16xf32>
    %20 = vector.multi_reduction <add>, %19, %cst_13 [1] : vector<16x1024xf32> to vector<16xf32>
    %21 = vector.shape_cast %20 : vector<16xf32> to vector<16x1xf32>
    %cst_14 = arith.constant 1.024000e+03 : f32
    %22 = vector.broadcast %cst_14 : f32 to vector<16x1xf32>
    %23 = arith.divf %21, %22 : vector<16x1xf32>
    %24 = tpu.concatenate %12, %23 in 1 : vector<16x1xf32>, vector<16x1xf32> -> vector<16x2xf32>
    %25 = tpu.transpose %24, [1, 0] : vector<16x2xf32> -> vector<2x16xf32>
    %c0_15 = arith.constant 0 : index
    %c0_16 = arith.constant 0 : index
    %26 = vector.load %arg6[%c0_15, %c0_16] : memref<2x16xf32, #tpu.memory_space<vmem>>, vector<2x16xf32>
    tpu.vector_store %arg6[%c0_15, %c0_16], %25 {strides = array<i32>} : memref<2x16xf32, #tpu.memory_space<vmem>>, vector<2x16xf32>,
    %c0_17 = arith.constant 0 : index
    %c0_18 = arith.constant 0 : index
    %27 = vector.load %arg3[%c0_17, %c0_18] : memref<16x32xf32, #tpu.memory_space<vmem>>, vector<16x32xf32>
    %cst_19 = arith.constant dense<0.000000e+00> : vector<2x32xf32>
    %28 = tpu.matmul %25, %27, %cst_19 {dimension_numbers = #tpu.dot_dimension_numbers<[1], [0], [0], [1], [0, 0, 1, 1], [], []>} : vector<2x16xf32>, vector<16x32xf32>, vector<2x32xf32> -> vector<2x32xf32>
    %c0_20 = arith.constant 0 : index
    %c0_21 = arith.constant 0 : index
    %29 = vector.load %arg4[%c0_20, %c0_21] : memref<1x32xf32, #tpu.memory_space<vmem>>, vector<1x32xf32>
    %30 = vector.broadcast %29 : vector<1x32xf32> to vector<2x32xf32>
    %31 = arith.addf %28, %30 : vector<2x32xf32>
    %cst_22 = arith.constant 0.000000e+00 : f32
    %32 = vector.broadcast %cst_22 : f32 to vector<2x32xf32>
    %33 = arith.maximumf %31, %32 : vector<2x32xf32>
    %c0_23 = arith.constant 0 : index
    %c0_24 = arith.constant 0 : index
    %34 = vector.load %arg5[%c0_23, %c0_24] : memref<2x32xf32, #tpu.memory_space<vmem>>, vector<2x32xf32>
    tpu.vector_store %arg5[%c0_23, %c0_24], %33 {strides = array<i32>} : memref<2x32xf32, #tpu.memory_space<vmem>>, vector<2x32xf32>,
    return
  }
}

</mosaic_0001>

<bundles_post_ra>
// kernel: enhanced_feature_extractor.1
= control target key start
LH: loop header
LB: loop body
LE: loop exit
PB: predicated region body
PF: predicated region fallthrough
CT: control target
= control target key end

     0   :  { %12 = vsyncpa [#allocation3], 0  ;;  %vm77_vm0 = vcmask 1042432   ;;  %v1214_v7 = vmov 0.0   ;;  %v1215_v13 = vmov 0   ;;  %vm1216_vm1 = vmmov 1   ;;  %s1619_s0 = inlined_call_operand.vmem [shape: f32[2,27,1024], index: 0, kind: input, shape index: {}]   ;;  %s1620_s1 = inlined_call_operand.vmem [shape: f32[16,27], index: 1, kind: input, shape index: {}]   ;;  %s1621_s2 = inlined_call_operand.vmem [shape: f32[16,1], index: 2, kind: input, shape index: {}]   ;;  %s1622_s3 = inlined_call_operand.vmem [shape: f32[16,32], index: 3, kind: input, shape index: {}]   ;;  %s1623_s4 = inlined_call_operand.vmem [shape: f32[1,32], index: 4, kind: input, shape index: {}]   ;;  %s1624_s5 = inlined_call_operand.hbm [shape: f32[2,32], index: 5, kind: output, shape index: {0}]   ;;  %s1625_s6 = inlined_call_operand.hbm [shape: f32[2,16], index: 6, kind: output, shape index: {1}]  }
   0x1   :  { %v29_v0 = vld [vmem:[%s1619_s0 + $0x8] sm:$0xff]  ;;  %v31_v2 = vld [vmem:[%s1619_s0 + $0x18] sm:$0xff]  ;;  %v28_v5 = vld [vmem:[%s1619_s0] sm:$0xff]  ;;  %166 = vmatprep.mubr.f32.mxu0 %v1214_v7  ;;  %243 = vmatprep.mubr.f32.mxu1 %v1214_v7  ;;  %vm70_vm3 = vcmask 220160  }
   0x2   :  { %v37_v1 = vld [vmem:[%s1619_s0 + $0x48] sm:$0xff]  ;;  %v39_v4 = vld [vmem:[%s1619_s0 + $0x58] sm:$0xff]  ;;  %v36_v6 = vld [vmem:[%s1619_s0 + $0x40] sm:$0xff]  ;;  %1165 = vset.pattern.permute.xlu0 %v1215_v13 }
   0x3   :  { %v1075_v3 = vpack.c.bf16 %v37_v1, %v29_v0  ;;  %v1085_v8 = vpack.c.bf16 %v39_v4, %v31_v2  ;;  %v1077_v9 = vpack.c.bf16 %v36_v6, %v28_v5  ;;  %v30_v10 = vld [vmem:[%s1619_s0 + $0x10] sm:$0xff]  ;;  %v45_v12 = vld [vmem:[%s1619_s0 + $0x88] sm:$0xff]  ;;  %vm1289_vm2 = vmpackc.low %vm77_vm0, %vm1216_vm1 }
   0x4   :  { %v38_v11 = vld [vmem:[%s1619_s0 + $0x50] sm:$0xff]  ;;  %v53_v15 = vld [vmem:[%s1619_s0 + $0xc8] sm:$0x7]  ;;  %v47_v17 = vld [vmem:[%s1619_s0 + $0x98] sm:$0xff] }
   0x5   :  { %1076 = vmatprep.subr.bf16.mxu0 %v1075_v3  ;;  %v1087_v14 = vpack.c.bf16 %v38_v11, %v30_v10  ;;  %1086 = vmatprep.subr.bf16.mxu1 %v1085_v8  ;;  %v1079_v18 = vpack.c.bf16 %v53_v15, %v45_v12  ;;  %v55_v19 = vld [vmem:[%s1619_s0 + $0xd8] sm:$0x7]  ;;  %v44_v20 = vld [vmem:[%s1619_s0 + $0x80] sm:$0xff]  ;;  %v46_v24 = vld [vmem:[%s1619_s0 + $0x90] sm:$0xff] }
   0x6   :  { %1078 = vmatpush1.bf16.msra.mxu0 %v1077_v9  ;;  %v52_v21 = vld [vmem:[%s1619_s0 + $0xc0] sm:$0x7]  ;;  %v1089_v22 = vpack.c.bf16 %v55_v19, %v47_v17  ;;  %v54_v25 = vld [vmem:[%s1619_s0 + $0xd0] sm:$0x7]  ;;  %v33_v27 = vld [vmem:[%s1619_s0 + $0x28] sm:$0xff] }
   0x7   :  { %1088 = vmatpush1.bf16.msra.mxu1 %v1087_v14  ;;  %v1082_v23 = vpack.c.bf16 %v52_v21, %v44_v20  ;;  %1081 = vmatprep.subr.msk.bf16.mxu0 %vm1289_vm2, %v1079_v18  ;;  %v1092_v26 = vpack.c.bf16 %v54_v25, %v46_v24  ;;  %v41_v28 = vld [vmem:[%s1619_s0 + $0x68] sm:$0xff]  ;;  %v35_v29 = vld [vmem:[%s1619_s0 + $0x38] sm:$0xff]  ;;  %v32_v32 = vld [vmem:[%s1619_s0 + $0x20] sm:$0xff] }
   0x8   :  { %1091 = vmatprep.subr.msk.bf16.mxu1 %vm1289_vm2, %v1089_v22  ;;  %v1095_v30 = vpack.c.bf16 %v41_v28, %v33_v27  ;;  %v43_v31 = vld [vmem:[%s1619_s0 + $0x78] sm:$0xff]  ;;  %v40_v33 = vld [vmem:[%s1619_s0 + $0x60] sm:$0xff]  ;;  %v34_v37 = vld [vmem:[%s1619_s0 + $0x30] sm:$0xff] }
   0x9   :  { %v1338_v34 = vld [vmem:[%s1620_s1] sm:$0xff]  ;;  %v1105_v35 = vpack.c.bf16 %v43_v31, %v35_v29  ;;  %v1097_v36 = vpack.c.bf16 %v40_v33, %v32_v32  ;;  %v42_v38 = vld [vmem:[%s1619_s0 + $0x70] sm:$0xff]  ;;  %v49_v40 = vld [vmem:[%s1619_s0 + $0xa8] sm:$0xff] }
   0xa   :  { %1084 = vmatpush1.bf16.msk.msra.mxu0 %vm1289_vm2, %v1082_v23  ;;  %v1107_v39 = vpack.c.bf16 %v42_v38, %v34_v37  ;;  %v57_v41 = vld [vmem:[%s1619_s0 + $0xe8] sm:$0x7]  ;;  %v51_v42 = vld [vmem:[%s1619_s0 + $0xb8] sm:$0xff]  ;;  %v48_v46 = vld [vmem:[%s1619_s0 + $0xa0] sm:$0xff] }
   0xb   :  { %1094 = vmatpush1.bf16.msk.msra.mxu1 %vm1289_vm2, %v1092_v26  ;;  %1096 = vmatprep.subr.bf16.mxu0 %v1095_v30  ;;  %v1360_v43 = vld [vmem:[%s1620_s1 + $0x8] sm:$0xff]  ;;  %v1099_v44 = vpack.c.bf16 %v57_v41, %v49_v40  ;;  %v59_v45 = vld [vmem:[%s1619_s0 + $0xf8] sm:$0x7]  ;;  %v56_v47 = vld [vmem:[%s1619_s0 + $0xe0] sm:$0x7] }
   0xc   :  { %1106 = vmatprep.subr.bf16.mxu1 %v1105_v35  ;;  %v1109_v48 = vpack.c.bf16 %v59_v45, %v51_v42  ;;  %v50_v49 = vld [vmem:[%s1619_s0 + $0xb0] sm:$0xff]  ;;  %v1016_v51 = vld [vmem:[%s1619_s0 + $0x108] sm:$0xff]  ;;  %v1102_v52 = vpack.c.bf16 %v56_v47, %v48_v46  ;;  %v1018_v54 = vld [vmem:[%s1619_s0 + $0x118] sm:$0xff] }
   0xd   :  { %1001 = vmatmul.mubr.msk.f32.vlgmr.msra.gmra.mrb[0].mxu0 %vm70_vm3, %v1338_v34  ;;  %v58_v50 = vld [vmem:[%s1619_s0 + $0xf0] sm:$0x7]  ;;  %v1024_v53 = vld [vmem:[%s1619_s0 + $0x148] sm:$0xff]  ;;  %v1026_v55 = vld [vmem:[%s1619_s0 + $0x158] sm:$0xff] }
   0xe   :  { %1005 = vmatmul.mubr.msk.f32.vlgmr.msra.gmra.mrb[0].mxu1 %vm70_vm3, %v1338_v34  ;;  %1098 = vmatpush1.bf16.msra.mxu0 %v1097_v36  ;;  %v1112_v56 = vpack.c.bf16 %v58_v50, %v50_v49  ;;  %v1015_v57 = vld [vmem:[%s1619_s0 + $0x100] sm:$0xff]  ;;  %v1115_v59 = vpack.c.bf16 %v1024_v53, %v1016_v51  ;;  %v1017_v60 = vld [vmem:[%s1619_s0 + $0x110] sm:$0xff]  ;;  %v1125_v62 = vpack.c.bf16 %v1026_v55, %v1018_v54  ;;  %v1032_v63 = vld [vmem:[%s1619_s0 + $0x188] sm:$0xff] }
   0xf   :  { %1108 = vmatpush1.bf16.msra.mxu1 %v1107_v39  ;;  %172 = vmatprep.mubr.f32.mxu0 %v1214_v7  ;;  %v1023_v58 = vld [vmem:[%s1619_s0 + $0x140] sm:$0xff]  ;;  %v1025_v61 = vld [vmem:[%s1619_s0 + $0x150] sm:$0xff]  ;;  %v1040_v0 = vld [vmem:[%s1619_s0 + $0x1c8] sm:$0x7] }
  0x10   :  { %249 = vmatprep.mubr.f32.mxu1 %v1214_v7  ;;  %1101 = vmatprep.subr.msk.bf16.mxu0 %vm1289_vm2, %v1099_v44  ;;  %v1117_v1 = vpack.c.bf16 %v1023_v58, %v1015_v57  ;;  %v1034_v2 = vld [vmem:[%s1619_s0 + $0x198] sm:$0xff]  ;;  %v1127_v4 = vpack.c.bf16 %v1025_v61, %v1017_v60  ;;  %v1031_v5 = vld [vmem:[%s1619_s0 + $0x180] sm:$0xff]  ;;  %v1119_v8 = vpack.c.bf16 %v1040_v0, %v1032_v63  ;;  %v1033_v9 = vld [vmem:[%s1619_s0 + $0x190] sm:$0xff] }
  0x11   :  { %1002 = vmatmul.mubr.msk.f32.gmra.mrb[2].mxu0 %vm70_vm3, %v1360_v43  ;;  %1111 = vmatprep.subr.msk.bf16.mxu1 %vm1289_vm2, %v1109_v48  ;;  %v1042_v3 = vld [vmem:[%s1619_s0 + $0x1d8] sm:$0x7]  ;;  %v1039_v6 = vld [vmem:[%s1619_s0 + $0x1c0] sm:$0x7]  ;;  %v1041_v10 = vld [vmem:[%s1619_s0 + $0x1d0] sm:$0x7] }
  0x12   :  { %1006 = vmatmul.mubr.msk.f32.gmra.mrb[2].mxu1 %vm70_vm3, %v1360_v43  ;;  %1104 = vmatpush1.bf16.msk.msra.mxu0 %vm1289_vm2, %v1102_v52  ;;  %v1129_v11 = vpack.c.bf16 %v1042_v3, %v1034_v2  ;;  %v1020_v12 = vld [vmem:[%s1619_s0 + $0x128] sm:$0xff]  ;;  %v1122_v14 = vpack.c.bf16 %v1039_v6, %v1031_v5  ;;  %v1022_v15 = vld [vmem:[%s1619_s0 + $0x138] sm:$0xff]  ;;  %v1132_v18 = vpack.c.bf16 %v1041_v10, %v1033_v9  ;;  %v1019_v19 = vld [vmem:[%s1619_s0 + $0x120] sm:$0xff] }
  0x13   :  { %1114 = vmatpush1.bf16.msk.msra.mxu1 %vm1289_vm2, %v1112_v56  ;;  %320 = vmatprep.mubr.f32.mxu0 %v1214_v7  ;;  %v1028_v13 = vld [vmem:[%s1619_s0 + $0x168] sm:$0xff]  ;;  %v1030_v17 = vld [vmem:[%s1619_s0 + $0x178] sm:$0xff]  ;;  %v1027_v20 = vld [vmem:[%s1619_s0 + $0x160] sm:$0xff] }
  0x14   :  { %397 = vmatprep.mubr.f32.mxu1 %v1214_v7  ;;  %1116 = vmatprep.subr.bf16.mxu0 %v1115_v59  ;;  %v1135_v21 = vpack.c.bf16 %v1028_v13, %v1020_v12  ;;  %v1021_v22 = vld [vmem:[%s1619_s0 + $0x130] sm:$0xff]  ;;  %v1145_v24 = vpack.c.bf16 %v1030_v17, %v1022_v15  ;;  %v1036_v25 = vld [vmem:[%s1619_s0 + $0x1a8] sm:$0xff] }
  0x15   :  { %1009 = vmatmul.mubr.msk.f32.vlgmr.msra.gmra.mrb[4].mxu0 %vm70_vm3, %v1338_v34  ;;  %1126 = vmatprep.subr.bf16.mxu1 %v1125_v62  ;;  %v1029_v23 = vld [vmem:[%s1619_s0 + $0x170] sm:$0xff]  ;;  %v1044_v26 = vld [vmem:[%s1619_s0 + $0x1e8] sm:$0x7] }
  0x16   :  { %1013 = vmatmul.mubr.msk.f32.vlgmr.msra.gmra.mrb[4].mxu1 %vm70_vm3, %v1338_v34  ;;  %1118 = vmatpush1.bf16.msra.mxu0 %v1117_v1 }
  0x17   :  { %1128 = vmatpush1.bf16.msra.mxu1 %v1127_v4  ;;  %326 = vmatprep.mubr.f32.mxu0 %v1214_v7 }
  0x18   :  { %403 = vmatprep.mubr.f32.mxu1 %v1214_v7  ;;  %1121 = vmatprep.subr.msk.bf16.mxu0 %vm1289_vm2, %v1119_v8 }
  0x19   :  { %1010 = vmatmul.mubr.msk.f32.gmra.mrb[6].mxu0 %vm70_vm3, %v1360_v43  ;;  %1131 = vmatprep.subr.msk.bf16.mxu1 %vm1289_vm2, %v1129_v11 }
  0x1a   :  { %13 = vsyncpa [#allocation5], 0  ;;  %1014 = vmatmul.mubr.msk.f32.gmra.mrb[6].mxu1 %vm70_vm3, %v1360_v43  ;;  %1124 = vmatpush1.bf16.msk.msra.mxu0 %vm1289_vm2, %v1122_v14  ;;  %v1137_v27 = vpack.c.bf16 %v1027_v20, %v1019_v19  ;;  %v1038_v28 = vld [vmem:[%s1619_s0 + $0x1b8] sm:$0xff]  ;;  %v1147_v30 = vpack.c.bf16 %v1029_v23, %v1021_v22  ;;  %v1035_v31 = vld [vmem:[%s1619_s0 + $0x1a0] sm:$0xff]  ;;  %v1139_v33 = vpack.c.bf16 %v1044_v26, %v1036_v25  ;;  %vm1218_vm4 = vmmov 0  }
  0x1b   :  { %v1046_v29 = vld [vmem:[%s1619_s0 + $0x1f8] sm:$0x7]  ;;  %1134 = vmatpush1.bf16.msk.msra.mxu1 %vm1289_vm2, %v1132_v18  ;;  %568 = vmatprep.mubr.f32.mxu0 %v1214_v7  ;;  %v1043_v32 = vld [vmem:[%s1619_s0 + $0x1e0] sm:$0x7]  ;;  %v1037_v35 = vld [vmem:[%s1619_s0 + $0x1b0] sm:$0xff]  ;;  %vm848_vm5 = vcmask 7168  }
  0x1c   :  { %645 = vmatprep.mubr.f32.mxu1 %v1214_v7  ;;  %1136 = vmatprep.subr.bf16.mxu0 %v1135_v21  ;;  %v1045_v36 = vld [vmem:[%s1619_s0 + $0x1f0] sm:$0x7]  ;;  %v1149_v37 = vpack.c.bf16 %v1046_v29, %v1038_v28  ;;  %v1142_v38 = vpack.c.bf16 %v1043_v32, %v1035_v31  ;;  %v26_v40 = vld [vmem:[%s1621_s2] sm:$0xff]  ;;  %v27_v41 = vld [vmem:[%s1621_s2 + $0x8] sm:$0xff]  ;;  %vm883_vm6 = vcmask 123904   ;;  %vm894_vm7 = vcmask 130048  }
  0x1d   :  { %1049 = vmatmul.mubr.msk.f32.vlgmr.msra.gmra.mrb[8].mxu0 %vm70_vm3, %v1338_v34  ;;  %1146 = vmatprep.subr.bf16.mxu1 %v1145_v24  ;;  %v1152_v39 = vpack.c.bf16 %v1045_v36, %v1037_v35 }
  0x1e   :  { %1053 = vmatmul.mubr.msk.f32.vlgmr.msra.gmra.mrb[8].mxu1 %vm70_vm3, %v1338_v34  ;;  %1138 = vmatpush1.bf16.msra.mxu0 %v1137_v27 }
  0x1f   :  { %1148 = vmatpush1.bf16.msra.mxu1 %v1147_v30  ;;  %574 = vmatprep.mubr.f32.mxu0 %v1214_v7 }
  0x20   :  { %651 = vmatprep.mubr.f32.mxu1 %v1214_v7  ;;  %1141 = vmatprep.subr.msk.bf16.mxu0 %vm1289_vm2, %v1139_v33 }
  0x21   :  { %1050 = vmatmul.mubr.msk.f32.gmra.mrb[10].mxu0 %vm70_vm3, %v1360_v43  ;;  %1151 = vmatprep.subr.msk.bf16.mxu1 %vm1289_vm2, %v1149_v37 }
  0x22   :  { %1054 = vmatmul.mubr.msk.f32.gmra.mrb[10].mxu1 %vm70_vm3, %v1360_v43  ;;  %1144 = vmatpush1.bf16.msk.msra.mxu0 %vm1289_vm2, %v1142_v38 }
  0x23   :  { %1154 = vmatpush1.bf16.msk.msra.mxu1 %vm1289_vm2, %v1152_v39  ;;  %722 = vmatprep.mubr.f32.mxu0 %v1214_v7 }
  0x24   :  { %799 = vmatprep.mubr.f32.mxu1 %v1214_v7  ;;  %62 = vperm.xlu0 %1165, %v26_v40  }
  0x25   :  { %1057 = vmatmul.mubr.msk.f32.vlgmr.msra.gmra.mrb[12].mxu0 %vm70_vm3, %v1338_v34 }
  0x26   :  { %1061 = vmatmul.mubr.msk.f32.vlgmr.msra.gmra.mrb[12].mxu1 %vm70_vm3, %v1338_v34  ;;  %728 = vmatprep.mubr.f32.mxu0 %v1214_v7 }
  0x27   :  { %805 = vmatprep.mubr.f32.mxu1 %v1214_v7 }
  0x28   :  { %67 = vperm.xlu0 %1165, %v27_v41  }
  0x29   :  { %1058 = vmatmul.mubr.msk.f32.gmra.mrb[14].mxu0 %vm70_vm3, %v1360_v43 }
  0x2a   :  { %1062 = vmatmul.mubr.msk.f32.gmra.mrb[14].mxu1 %vm70_vm3, %v1360_v43  ;;  %1072 = vmatprep.mubr.msk.f32.mxu0 %vm1218_vm4, %v1214_v7 }
  0xa3   :  { %v1549_v16 = vpop.permute.xlu0 %62 }
  0xa7   :  { %v1554_v48 = vpop.permute.xlu0 %67 }
  0xe0   :  { %v168_v42 = vpop.f32.mrb[0].mxu0 }
  0xe1   :  { %v169_v44 = vadd.f32 %v168_v42, %v1549_v16  ;;  %v170_v45 = vpop.f32.mrb[1].mxu0  ;;  %v245_v46 = vpop.f32.mrb[0].mxu1 }
  0xe2   :  { %v171_v34 = vadd.f32 %v170_v45, %v1549_v16  ;;  %v246_v47 = vadd.f32 %v245_v46, %v1549_v16  ;;  %v247_v49 = vpop.f32.mrb[1].mxu1 }
  0xe3   :  { %v410_v50 = vmax.f32 %v169_v44, 0.0  ;;  %v248_v51 = vadd.f32 %v247_v49, %v1549_v16 }
  0xe4   :  { %v411_v52 = vmax.f32 %v171_v34, 0.0  ;;  %v412_v53 = vmax.f32 %v246_v47, 0.0  ;;  %v174_v43 = vpop.f32.mrb[2].mxu0 }
  0xe5   :  { %v175_v54 = vadd.f32 %v174_v43, %v1554_v48  ;;  %v176_v55 = vpop.f32.mrb[3].mxu0  ;;  %v251_v56 = vpop.f32.mrb[2].mxu1  ;;  %v413_v59 = vmax.f32 %v248_v51, 0.0 }
  0xe6   :  { %v426_v57 = vadd.f32 %v411_v52, %v410_v50  ;;  %v177_v58 = vadd.f32 %v176_v55, %v1554_v48  ;;  %v252_v60 = vadd.f32 %v251_v56, %v1554_v48  ;;  %v253_v61 = vpop.f32.mrb[3].mxu1 }
  0xe7   :  { %v418_v62 = vmax.f32 %v175_v54, 0.0  ;;  %v254_v63 = vadd.f32 %v253_v61, %v1554_v48 }
  0xe8   :  { %v427_v0 = vadd.f32 %v426_v57, %v412_v53  ;;  %v419_v1 = vmax.f32 %v177_v58, 0.0  ;;  %v420_v2 = vmax.f32 %v252_v60, 0.0  ;;  %v322_v3 = vpop.f32.mrb[4].mxu0 }
  0xe9   :  { %v323_v4 = vadd.f32 %v322_v3, %v1549_v16  ;;  %v421_v5 = vmax.f32 %v254_v63, 0.0  ;;  %v324_v6 = vpop.f32.mrb[5].mxu0  ;;  %v399_v8 = vpop.f32.mrb[4].mxu1 }
  0xea   :  { %v435_v9 = vadd.f32 %v419_v1, %v418_v62  ;;  %v428_v10 = vadd.f32 %v427_v0, %v413_v59  ;;  %v325_v11 = vadd.f32 %v324_v6, %v1549_v16  ;;  %v400_v12 = vadd.f32 %v399_v8, %v1549_v16  ;;  %v401_v13 = vpop.f32.mrb[5].mxu1 }
  0xeb   :  { %v414_v14 = vmax.f32 %v323_v4, 0.0  ;;  %v402_v19 = vadd.f32 %v401_v13, %v1549_v16 }
  0xec   :  { %v436_v15 = vadd.f32 %v435_v9, %v420_v2  ;;  %v415_v17 = vmax.f32 %v325_v11, 0.0  ;;  %v328_v18 = vpop.f32.mrb[6].mxu0  ;;  %v416_v22 = vmax.f32 %v400_v12, 0.0 }
  0xed   :  { %v429_v20 = vadd.f32 %v428_v10, %v414_v14  ;;  %v329_v21 = vadd.f32 %v328_v18, %v1554_v48  ;;  %v330_v23 = vpop.f32.mrb[7].mxu0  ;;  %v405_v24 = vpop.f32.mrb[6].mxu1  ;;  %v417_v32 = vmax.f32 %v402_v19, 0.0 }
  0xee   :  { %v437_v25 = vadd.f32 %v436_v15, %v421_v5  ;;  %v331_v26 = vadd.f32 %v330_v23, %v1554_v48  ;;  %v407_v27 = vpop.f32.mrb[7].mxu1  ;;  %v406_v30 = vadd.f32 %v405_v24, %v1554_v48 }
  0xef   :  { %v430_v28 = vadd.f32 %v429_v20, %v415_v17  ;;  %v422_v29 = vmax.f32 %v329_v21, 0.0  ;;  %v408_v36 = vadd.f32 %v407_v27, %v1554_v48 }
  0xf0   :  { %v423_v31 = vmax.f32 %v331_v26, 0.0  ;;  %v570_v33 = vpop.f32.mrb[8].mxu0  ;;  %v424_v46 = vmax.f32 %v406_v30, 0.0 }
  0xf1   :  { %v438_v35 = vadd.f32 %v437_v25, %v422_v29  ;;  %v571_v37 = vadd.f32 %v570_v33, %v1549_v16  ;;  %v647_v38 = vpop.f32.mrb[8].mxu1  ;;  %v572_v39 = vpop.f32.mrb[9].mxu0  ;;  %v431_v40 = vadd.f32 %v430_v28, %v416_v22  ;;  %v425_v53 = vmax.f32 %v408_v36, 0.0 }
  0xf2   :  { %v648_v41 = vadd.f32 %v647_v38, %v1549_v16  ;;  %v573_v42 = vadd.f32 %v572_v39, %v1549_v16  ;;  %v649_v44 = vpop.f32.mrb[9].mxu1 }
  0xf3   :  { %v439_v45 = vadd.f32 %v438_v35, %v423_v31  ;;  %v812_v34 = vmax.f32 %v571_v37, 0.0  ;;  %v432_v47 = vadd.f32 %v431_v40, %v417_v32  ;;  %v650_v50 = vadd.f32 %v649_v44, %v1549_v16  ;;  %v885_v44 = vld [vmem:[%s1622_s3] sm:$0xff] }
  0xf4   :  { %v813_v49 = vmax.f32 %v573_v42, 0.0  ;;  %v576_v51 = vpop.f32.mrb[10].mxu0  ;;  %v814_v56 = vmax.f32 %v648_v41, 0.0 }
  0xf5   :  { %v440_v52 = vadd.f32 %v439_v45, %v424_v46  ;;  %v577_v43 = vadd.f32 %v576_v51, %v1554_v48  ;;  %v653_v54 = vpop.f32.mrb[10].mxu1  ;;  %v578_v55 = vpop.f32.mrb[11].mxu0  ;;  %433 = vadd.xlane.f32.xlu1 %v432_v47  ;;  %v815_v63 = vmax.f32 %v650_v50, 0.0  ;;  %v886_v45 = vld [vmem:[%s1622_s3 + $0x8] sm:$0xff]  ;;  %v1217_v46 = vmov 0.0|0.0   ;;  %s1219_s3 = smov [#allocation4]  }
  0xf6   :  { %v828_v57 = vadd.f32 %v813_v49, %v812_v34  ;;  %v654_v58 = vadd.f32 %v653_v54, %v1554_v48  ;;  %v579_v59 = vadd.f32 %v578_v55, %v1554_v48  ;;  %v655_v60 = vpop.f32.mrb[11].mxu1  ;;  %1155 = vmatprep.subr.bf16.mxu0 %v1217_v46  ;;  %s987_s12 = sshll.u32 %s1219_s3, 4  ;;  %s988_s12 = int_to_ptr.vmem [resolvable:$true] %s987_s12 }
  0xf7   :  { %v820_v61 = vmax.f32 %v577_v43, 0.0  ;;  %v441_v62 = vadd.f32 %v440_v52, %v425_v53  ;;  %v656_v2 = vadd.f32 %v655_v60, %v1554_v48  ;;  %s1166_s13 = scalar_lea.vmem %s988_s12, 32  ;;  %p1171_p1 = scmp.lt.s32.totalorder %s988_s12, %s988_s12 }
  0xf8   :  { %v829_v0 = vadd.f32 %v828_v57, %v814_v56  ;;  %v821_v1 = vmax.f32 %v579_v59, 0.0  ;;  %v724_v3 = vpop.f32.mrb[12].mxu0  ;;  %v822_v9 = vmax.f32 %v654_v58, 0.0  ;;  %p1167_p0 = scmp.ne.s32.totalorder %s988_s12, %s1166_s13  ;;  %p1172_p2 = scmp.lt.s32.totalorder %s1166_s13, %s1166_s13 }
  0xf9   :  { %v725_v4 = vadd.f32 %v724_v3, %v1549_v16  ;;  %v801_v5 = vpop.f32.mrb[12].mxu1  ;;  %v726_v6 = vpop.f32.mrb[13].mxu0  ;;  %442 = vadd.xlane.f32.xlu0 %v441_v62  ;;  %v823_v15 = vmax.f32 %v656_v2, 0.0 }
  0xfa   :  { %v830_v8 = vadd.f32 %v829_v0, %v815_v63  ;;  %v837_v10 = vadd.f32 %v821_v1, %v820_v61  ;;  %v727_v11 = vadd.f32 %v726_v6, %v1549_v16  ;;  %v803_v12 = vpop.f32.mrb[13].mxu1  ;;  %v802_v14 = vadd.f32 %v801_v5, %v1549_v16  ;;  %p1173_p3 = por %p1172_p2, %p1171_p1 }
  0xfb   :  { %v816_v13 = vmax.f32 %v725_v4, 0.0  ;;  %v804_v21 = vadd.f32 %v803_v12, %v1549_v16 }
  0xfc   :  { %v838_v17 = vadd.f32 %v837_v10, %v822_v9  ;;  %v817_v18 = vmax.f32 %v727_v11, 0.0  ;;  %v730_v19 = vpop.f32.mrb[14].mxu0  ;;  %v818_v28 = vmax.f32 %v802_v14, 0.0  ;;  %p1174_p4 = pnand %p1173_p3, %p1167_p0 }
  0xfd   :  { %v831_v20 = vadd.f32 %v830_v8, %v816_v13  ;;  %v731_v22 = vadd.f32 %v730_v19, %v1554_v48  ;;  %v807_v23 = vpop.f32.mrb[14].mxu1  ;;  %v732_v24 = vpop.f32.mrb[15].mxu0  ;;  %v819_v33 = vmax.f32 %v804_v21, 0.0 }
  0xfe   :  { %v839_v25 = vadd.f32 %v838_v17, %v823_v15  ;;  %v733_v26 = vadd.f32 %v732_v24, %v1554_v48  ;;  %v809_v27 = vpop.f32.mrb[15].mxu1  ;;  %v808_v31 = vadd.f32 %v807_v23, %v1554_v48 }
  0xff   :  { %v832_v29 = vadd.f32 %v831_v20, %v817_v18  ;;  %v824_v30 = vmax.f32 %v731_v22, 0.0  ;;  %v810_v36 = vadd.f32 %v809_v27, %v1554_v48  ;;  %v1156_v48 = vpack.c.bf16 %v886_v45, %v885_v44 }
 0x100   :  { %v825_v32 = vmax.f32 %v733_v26, 0.0  ;;  %v826_v16 = vmax.f32 %v808_v31, 0.0 }
 0x101   :  { %v840_v35 = vadd.f32 %v839_v25, %v824_v30  ;;  %v833_v37 = vadd.f32 %v832_v29, %v818_v28  ;;  %v827_v40 = vmax.f32 %v810_v36, 0.0  ;;  %1157 = vmatpush3.bf16.msra.mxu0 %v1156_v48 }
 0x103   :  { %v841_v38 = vadd.f32 %v840_v35, %v825_v32  ;;  %v834_v39 = vadd.f32 %v833_v37, %v819_v33 }
 0x105   :  { %835 = vadd.xlane.f32.xlu1 %v834_v39  ;;  %v842_v41 = vadd.f32 %v841_v38, %v826_v16 }
 0x107   :  { %v843_v42 = vadd.f32 %v842_v41, %v827_v40 }
 0x109   :  { %844 = vadd.xlane.f32.xlu1 %v843_v42 }
 0x182   :  { %v434_v34 = vpop.xlane.xlu1 %433 }
 0x183   :  { %v445_v49 = vmul.f32 0.0009765625, %v434_v34 }
 0x186   :  { %v443_v51 = vpop.xlane.xlu0 %442 }
 0x187   :  { %v446_v43 = vmul.f32 0.0009765625, %v443_v51 }
 0x192   :  { %v836_v47 = vpop.xlane.xlu1 %835 }
 0x193   :  { %v846_v50 = vmul.f32 0.0009765625, %v836_v47 }
 0x195   :  { %v849_v52 = vsel %vm848_vm5, %v445_v49, %v846_v50 }
 0x196   :  { %851 = vxpose.xlu1.b32.start [1/2] (short) (narrow) %v849_v52, 8  ;;  %v845_v53 = vpop.xlane.xlu1 %844 }
 0x197   :  { %v847_v54 = vmul.f32 0.0009765625, %v845_v53 }
 0x199   :  { %v850_v55 = vsel %vm848_vm5, %v446_v43, %v847_v54 }
 0x19a   :  { %852 = vxpose.xlu1.b32.end [2/2] (short) (narrow) %v850_v55, 8 }
 0x216   :  { %v867_v56 = vpop.trf.xlu1 }
 0x217   :  { %884 = vst.msk [vmem:[#allocation4] sm:$0x3] %vm883_vm6, %v867_v56  ;;  %1073 = vmatmul.mubr.msk.f32.vlgmr.msra.gmra.mrb[16].mxu0 %vm894_vm7, %v867_v56 }
 0x218   :  { %1177 = shalt.err (!%p1174_p4)
}
 0x219   :  { %s1178_s15 = scalar_lea.hbm %s1625_s6, 32 }
 0x21a   :  { %p1179_p5 = scmp.ne.s32.totalorder %s1625_s6, %s1178_s15  ;;  %p1182_p6 = scmp.lt.u32.totalorder %s1178_s15, %s1625_s6 }
 0x21c   :  { %p1184_p7 = pnand %p1182_p6, %p1179_p5 }
 0x21e   :  { %1187 = shalt.err (!%p1184_p7)
}
 0x21f   :  { %990 = dma.vmem_to_hbm [thread:$0]  %s988_s12, 32, %s1625_s6, [#allocation5]   ;;  %v1063_v7 = vld [vmem:[%s1623_s4] ss:$0 sm:$0xff]  ;;  %vm969_vm8 = vcmask 254976  }
 0x220   :  { %s1220_s24 = smov [#allocation2]  }
 0x221   :  { %s977_s25 = sshll.u32 %s1220_s24, 4  ;;  %s978_s25 = int_to_ptr.vmem [resolvable:$true] %s977_s25 }
 0x222   :  { %s1188_s26 = scalar_lea.vmem %s978_s25, 32  ;;  %p1193_p9 = scmp.lt.s32.totalorder %s978_s25, %s978_s25 }
 0x223   :  { %p1189_p8 = scmp.ne.s32.totalorder %s978_s25, %s1188_s26  ;;  %p1194_p10 = scmp.lt.s32.totalorder %s1188_s26, %s1188_s26 }
 0x225   :  { %p1195_p11 = por %p1194_p10, %p1193_p9 }
 0x227   :  { %p1196_p12 = pnand %p1195_p11, %p1189_p8 }
 0x2ea   :  { %v964_v57 = vpop.f32.mrb[16].mxu0 }
 0x2eb   :  { %v965_v58 = vadd.f32 %v1063_v7, %v964_v57  ;;  %v1074_v59 = vpop.f32.mrb[17].mxu0 }
 0x2ed   :  { %v968_v60 = vmax.f32 %v965_v58, 0.0 }
 0x2ef   :  { %970 = vst.msk [vmem:[#allocation2] sm:$0x3] %vm969_vm8, %v968_v60 }
 0x2f0   :  { %1199 = shalt.err (!%p1196_p12)
}
 0x2f1   :  { %s1200_s4 = scalar_lea.hbm %s1624_s5, 32 }
 0x2f2   :  { %p1201_p13 = scmp.ne.s32.totalorder %s1624_s5, %s1200_s4  ;;  %p1204_p0 = scmp.lt.u32.totalorder %s1200_s4, %s1624_s5 }
 0x2f4   :  { %p1206_p1 = pnand %p1204_p0, %p1201_p13 }
 0x2f6   :  { %1209 = shalt.err (!%p1206_p1)
}
 0x2f7   :  { %980 = dma.vmem_to_hbm [thread:$0]  %s978_s25, 32, %s1624_s5, [#allocation3]  }
 0x2f8   :  { %1210 = dma.done.wait [#allocation3], 32  }
 0x2f9   :  { %1211 = vsyncadd [#allocation3], 4294967264 }
 0x2fa   :  { %1212 = dma.done.wait [#allocation5], 32  }
 0x2fb   :  { %1213 = vsyncadd [#allocation5], 4294967264 }
 0x2fc   :  { %997 = vsyncpa [#allocation3], 1 }
 0x2fd   :  { %998 = vsyncpa [#allocation5], 1 }

</bundles_post_ra>
